<compile_context>
chip_gen: v7x
topology: tpu7x:2x2x1
jax: 0.10.0
libtpu: 0.0.40
codegen_flags: <defaults>
</compile_context>

<pallas_src>
import functools

import jax
import jax.numpy as jnp
from jax.experimental import pallas as pl
from jax.experimental.pallas import tpu as pltpu


H = 512             # hidden width
MAX_TILE_B = 2048   # max batch rows per grid step


def _l1_on_mxu_default():
    """Layer-1 placement: MXU (bf16) on v6e/v7x, VPU (f32) on v5e and older."""
    try:
        kind = jax.devices()[0].device_kind.lower()
    except Exception:
        return True
    return not any(v in kind for v in ("v2", "v3", "v4", "v5"))


_L1_ON_MXU = _l1_on_mxu_default()


def _pick_tile_b(n):
    """Largest tile <= MAX_TILE_B, aiming for >=2 tiles (v7x has 2 TensorCores)."""
    n8 = ((n + 7) // 8) * 8
    if n8 <= 512:
        return n8                                     # one small tile, no waste
    half = ((n8 + 1) // 2 + 255) // 256 * 256
    return min(MAX_TILE_B, half)


# ----------------------------------------------------------------------------
# Kernel factory: fused 3-layer MLP on one batch tile.
# ----------------------------------------------------------------------------
def _make_kernel(l1_on_mxu):
    def kernel(f_ref, w1_ref, b1_ref, w2_ref, b2_ref, w3t_ref, b3_ref, o_ref):
        f = f_ref[...]                      # [TB, K] f32 (K = 2 or 3)
        b1 = b1_ref[...]                    # [1, H]  f32

        # ---- Layer 1 ----
        if l1_on_mxu:
            # v6e/v7x: tiny-K matmul costs ~half a layer-2 MXU pass and frees the
            # VALU slots the f32 (no-FMA) multiply-add chain was saturating.
            h = jnp.dot(f.astype(jnp.bfloat16),
                        w1_ref[...].astype(jnp.bfloat16),
                        preferred_element_type=jnp.float32) + b1
        else:
            # v5e: MXU is the binding unit; keep layer 1 on the VPU in f32.
            w1 = w1_ref[...]
            h = b1
            for j in range(f.shape[1]):
                h = h + f[:, j:j + 1] * w1[j:j + 1, :]
        h = jnp.maximum(h, 0.0)             # [TB, H] f32

        # ---- Layer 2: MXU, bf16 operands, f32 accumulation ----
        h = jnp.dot(h.astype(jnp.bfloat16), w2_ref[...],
                    preferred_element_type=jnp.float32)
        h = jnp.maximum(h + b2_ref[...], 0.0)          # [TB, H] f32

        # ---- Layer 3 (N=2) off the MXU: broadcast mul (VPU) + lane reduce (XLU)
        w3t = w3t_ref[...]                  # [2, H] f32 (row j = output column j)
        b3 = b3_ref[...]                    # [1, 2]  f32
        c0 = jnp.sum(h * w3t[0:1, :], axis=-1) + b3[0, 0]   # [TB]
        c1 = jnp.sum(h * w3t[1:2, :], axis=-1) + b3[0, 1]   # [TB]

        # Lane-dense [2, TB] output block -> unmasked full-lane stores.
        o_ref[0, :] = c0.astype(o_ref.dtype)
        o_ref[1, :] = c1.astype(o_ref.dtype)

    return kernel


# ----------------------------------------------------------------------------
# pallas_call wrapper: tile the batch, keep weights resident.
# ----------------------------------------------------------------------------
@functools.partial(jax.jit, static_argnames=("l1_on_mxu",))
def _mlp_pallas(f, w1, b1, w2, b2, w3t, b3, *, l1_on_mxu):
    """f: [N, K] f32 features (x columns, optionally + time column) -> [N, 2]."""
    n, k = f.shape
    tile_b = _pick_tile_b(n)
    n_pad = pl.cdiv(n, tile_b) * tile_b
    if n_pad != n:
        f = jnp.pad(f, ((0, n_pad - n), (0, 0)))
    grid = (n_pad // tile_b,)

    weight_bytes = (k * H + H) * 4 + H * H * 2 + H * 4 + 2 * H * 4 + 2 * 4
    cost = pl.CostEstimate(
        flops=2 * n_pad * (k * H + H * H + H * 2) + 3 * n_pad * H,
        transcendentals=0,
        bytes_accessed=n_pad * (k + 2) * 4 + weight_bytes,
    )

    out_t = pl.pallas_call(
        _make_kernel(l1_on_mxu),
        out_shape=jax.ShapeDtypeStruct((2, n_pad), jnp.float32),
        grid=grid,
        in_specs=[
            pl.BlockSpec((tile_b, k), lambda i: (i, 0)),   # features (tiled)
            pl.BlockSpec((k, H), lambda i: (0, 0)),        # w1 (resident)
            pl.BlockSpec((1, H), lambda i: (0, 0)),        # b1
            pl.BlockSpec((H, H), lambda i: (0, 0)),        # w2 bf16 (resident)
            pl.BlockSpec((1, H), lambda i: (0, 0)),        # b2
            pl.BlockSpec((2, H), lambda i: (0, 0)),        # w3^T (resident)
            pl.BlockSpec((1, 2), lambda i: (0, 0)),        # b3
        ],
        out_specs=pl.BlockSpec((2, tile_b), lambda i: (0, i)),
        compiler_params=pltpu.CompilerParams(
            dimension_semantics=("parallel",),
            vmem_limit_bytes=64 * 1024 * 1024,
        ),
        cost_estimate=cost,
    )(f, w1, b1, w2, b2, w3t, b3)
    return out_t[:, :n].T                                  # [N, 2]


# ----------------------------------------------------------------------------
# Net.forward semantics (time-column handling / concat handled in the wrapper).
# ----------------------------------------------------------------------------
def net_forward(x, t, params):
    w1, b1, w2, b2, w3t, b3 = params
    lead = x.shape[:-1]
    x2 = x.reshape(-1, x.shape[-1]).astype(jnp.float32)
    if isinstance(t, (int, float)) or jnp.ndim(t) < 2:
        # torch: t = ones_like(x[..., 0:1] * t) -> the time column is ALL ONES
        # (value of t discarded). Fold the constant contribution w1[2, :] into
        # the layer-1 bias and drop the [N, 1] time operand entirely.
        f = x2
        w1_use = w1[:2, :]
        b1_use = b1 + w1[2:3, :]
    else:
        tcol = jnp.broadcast_to(t, lead + (1,)).reshape(-1, 1).astype(jnp.float32)
        f = jnp.concatenate([x2, tcol], axis=-1)
        w1_use = w1
        b1_use = b1
    out = _mlp_pallas(f, w1_use, b1_use, w2, b2, w3t, b3, l1_on_mxu=_L1_ON_MXU)
    return out.reshape(*lead, 2)


# ----------------------------------------------------------------------------
# Params (PyTorch nn.Linear default init). Stored [in, out]; w2 in bf16 for the
# MXU (f32 accumulation in-kernel); w3 stored transposed [2, H] (lane-aligned).
# ----------------------------------------------------------------------------
def init_params(key):
    dims = [(3, H), (H, H), (H, 2)]
    raw = []
    for i, (fan_in, fan_out) in enumerate(dims):
        kw, kb = jax.random.split(jax.random.fold_in(key, i))
        bound = 1.0 / float(fan_in) ** 0.5
        w = jax.random.uniform(kw, (fan_in, fan_out), jnp.float32, -bound, bound)
        b = jax.random.uniform(kb, (1, fan_out), jnp.float32, -bound, bound)
        raw += [w, b]
    w1, b1, w2, b2, w3, b3 = raw
    return (w1, b1, w2.astype(jnp.bfloat16), b2, jnp.transpose(w3), b3)


def _reference_forward(x, t, params, l1_on_mxu):
    """Plain-JAX reference mirroring the module + the kernel's dtype choices."""
    w1, b1, w2, b2, w3t, b3 = params
    if isinstance(t, (int, float)) or jnp.ndim(t) < 2:
        tcol = jnp.ones_like(x[..., 0:1] * t)
    else:
        tcol = jnp.broadcast_to(t, x.shape[:-1] + (1,))
    xt = jnp.concatenate([x.astype(jnp.float32), tcol.astype(jnp.float32)], -1)
    if l1_on_mxu:
        h = jnp.dot(xt.astype(jnp.bfloat16), w1.astype(jnp.bfloat16),
                    preferred_element_type=jnp.float32) + b1
    else:
        h = xt @ w1 + b1
    h = jnp.maximum(h, 0.0)
    h = jnp.maximum(jnp.dot(h.astype(jnp.bfloat16), w2,
                            preferred_element_type=jnp.float32) + b2, 0.0)
    return h @ jnp.transpose(w3t) + b3


if __name__ == "__main__":
    key = jax.random.PRNGKey(0)
    k_param, k_x = jax.random.split(key)

    params = init_params(k_param)

    # --- Small batch, scalar t (module semantics -> time column of ones) -----
    batch = 8
    x = jax.random.normal(k_x, (batch, 2), jnp.float32)
    t_scalar = 0.37
    out1 = net_forward(x, t_scalar, params)
    jax.block_until_ready(out1)
    ref1 = _reference_forward(x, t_scalar, params, _L1_ON_MXU)
    assert out1.shape == (batch, 2)
    assert jnp.allclose(out1, ref1, atol=2e-2, rtol=2e-2), "scalar-t path mismatch"

    # --- Small batch, 2-D t tensor (real time column, K=3 feature matrix) ----
    t_2d = jnp.full((batch, 1), 0.37, jnp.float32)
    out2 = net_forward(x, t_2d, params)
    jax.block_until_ready(out2)
    ref2 = _reference_forward(x, t_2d, params, _L1_ON_MXU)
    assert jnp.allclose(out2, ref2, atol=2e-2, rtol=2e-2), "tensor-t path mismatch"

    # --- Larger batch: exercises multi-tile grid + batch padding + slicing ---
    batch2 = 520
    x_big = jax.random.normal(jax.random.fold_in(k_x, 1), (batch2, 2), jnp.float32)
    out3 = net_forward(x_big, 1, params)          # int t -> ones column
    jax.block_until_ready(out3)
    ref3 = _reference_forward(x_big, 1, params, _L1_ON_MXU)
    assert out3.shape == (batch2, 2)
    assert jnp.allclose(out3, ref3, atol=2e-2, rtol=2e-2), "multi-tile path mismatch"

    print("KERNEL_OK")
</pallas_src>

<mosaic_0001>
module attributes {stable_mosaic.version = 11 : i64} {
  func.func @kernel(%arg0: i32, %arg1: memref<8x2xf32, #tpu.memory_space<vmem>>, %arg2: memref<2x512xf32, #tpu.memory_space<vmem>>, %arg3: memref<1x512xf32, #tpu.memory_space<vmem>>, %arg4: memref<512x512xbf16, #tpu.memory_space<vmem>>, %arg5: memref<1x512xf32, #tpu.memory_space<vmem>>, %arg6: memref<2x512xf32, #tpu.memory_space<vmem>>, %arg7: memref<1x2xf32, #tpu.memory_space<vmem>>, %arg8: memref<2x8xf32, #tpu.memory_space<vmem>>) attributes {dimension_semantics = [#tpu.dimension_semantics<parallel>], iteration_bounds = array<i64: 1>, scalar_prefetch = 0 : i64, scratch_operands = 0 : i64, tpu.core_type = #tpu.core_type<tc>, window_params = [{transform_indices = @transform_0, window_bounds = array<i64: 8, 2>}, {pipeline_mode = #tpu.pipeline_mode<synchronous>, transform_indices = @transform_1, window_bounds = array<i64: 2, 512>}, {pipeline_mode = #tpu.pipeline_mode<synchronous>, transform_indices = @transform_2, window_bounds = array<i64: 1, 512>}, {pipeline_mode = #tpu.pipeline_mode<synchronous>, transform_indices = @transform_3, window_bounds = array<i64: 512, 512>}, {pipeline_mode = #tpu.pipeline_mode<synchronous>, transform_indices = @transform_4, window_bounds = array<i64: 1, 512>}, {pipeline_mode = #tpu.pipeline_mode<synchronous>, transform_indices = @transform_5, window_bounds = array<i64: 2, 512>}, {pipeline_mode = #tpu.pipeline_mode<synchronous>, transform_indices = @transform_6, window_bounds = array<i64: 1, 2>}, {transform_indices = @transform_7, window_bounds = array<i64: 2, 8>}]} {
    %c0 = arith.constant 0 : index
    %c0_0 = arith.constant 0 : index
    %0 = vector.load %arg1[%c0, %c0_0] : memref<8x2xf32, #tpu.memory_space<vmem>>, vector<8x2xf32>
    %c0_1 = arith.constant 0 : index
    %c0_2 = arith.constant 0 : index
    %1 = vector.load %arg3[%c0_1, %c0_2] : memref<1x512xf32, #tpu.memory_space<vmem>>, vector<1x512xf32>
    %2 = arith.truncf %0 : vector<8x2xf32> to vector<8x2xbf16>
    %c0_3 = arith.constant 0 : index
    %c0_4 = arith.constant 0 : index
    %3 = vector.load %arg2[%c0_3, %c0_4] : memref<2x512xf32, #tpu.memory_space<vmem>>, vector<2x512xf32>
    %4 = arith.truncf %3 : vector<2x512xf32> to vector<2x512xbf16>
    %cst = arith.constant dense<0.000000e+00> : vector<8x512xf32>
    %5 = tpu.matmul %2, %4, %cst {dimension_numbers = #tpu.dot_dimension_numbers<[1], [0], [0], [1], [0, 0, 1, 1], [], []>} : vector<8x2xbf16>, vector<2x512xbf16>, vector<8x512xf32> -> vector<8x512xf32>
    %6 = vector.broadcast %1 : vector<1x512xf32> to vector<8x512xf32>
    %7 = arith.addf %5, %6 : vector<8x512xf32>
    %cst_5 = arith.constant 0.000000e+00 : f32
    %8 = vector.broadcast %cst_5 : f32 to vector<8x512xf32>
    %9 = arith.maximumf %7, %8 : vector<8x512xf32>
    %10 = arith.truncf %9 : vector<8x512xf32> to vector<8x512xbf16>
    %c0_6 = arith.constant 0 : index
    %c0_7 = arith.constant 0 : index
    %11 = vector.load %arg4[%c0_6, %c0_7] : memref<512x512xbf16, #tpu.memory_space<vmem>>, vector<512x512xbf16>
    %cst_8 = arith.constant dense<0.000000e+00> : vector<8x512xf32>
    %12 = tpu.matmul %10, %11, %cst_8 {dimension_numbers = #tpu.dot_dimension_numbers<[1], [0], [0], [1], [0, 0, 1, 1], [], []>} : vector<8x512xbf16>, vector<512x512xbf16>, vector<8x512xf32> -> vector<8x512xf32>
    %c0_9 = arith.constant 0 : index
    %c0_10 = arith.constant 0 : index
    %13 = vector.load %arg5[%c0_9, %c0_10] : memref<1x512xf32, #tpu.memory_space<vmem>>, vector<1x512xf32>
    %14 = vector.broadcast %13 : vector<1x512xf32> to vector<8x512xf32>
    %15 = arith.addf %12, %14 : vector<8x512xf32>
    %cst_11 = arith.constant 0.000000e+00 : f32
    %16 = vector.broadcast %cst_11 : f32 to vector<8x512xf32>
    %17 = arith.maximumf %15, %16 : vector<8x512xf32>
    %c0_12 = arith.constant 0 : index
    %c0_13 = arith.constant 0 : index
    %18 = vector.load %arg6[%c0_12, %c0_13] : memref<2x512xf32, #tpu.memory_space<vmem>>, vector<2x512xf32>
    %c0_14 = arith.constant 0 : index
    %c0_15 = arith.constant 0 : index
    %19 = vector.load %arg7[%c0_14, %c0_15] : memref<1x2xf32, #tpu.memory_space<vmem>>, vector<1x2xf32>
    %20 = vector.extract_strided_slice %18 {offsets = [0, 0], sizes = [1, 512], strides = [1, 1]} : vector<2x512xf32> to vector<1x512xf32>
    %21 = vector.broadcast %20 : vector<1x512xf32> to vector<8x512xf32>
    %22 = arith.mulf %17, %21 : vector<8x512xf32>
    %cst_16 = arith.constant dense<0.000000e+00> : vector<8xf32>
    %23 = vector.multi_reduction <add>, %22, %cst_16 [1] : vector<8x512xf32> to vector<8xf32>
    %24 = vector.extract_strided_slice %19 {offsets = [0, 0], sizes = [1, 1], strides = [1, 1]} : vector<1x2xf32> to vector<1x1xf32>
    %25 = vector.extract %24[0, 0] : f32 from vector<1x1xf32>
    %26 = vector.broadcast %25 : f32 to vector<8xf32>
    %27 = arith.addf %23, %26 : vector<8xf32>
    %28 = vector.extract_strided_slice %18 {offsets = [1, 0], sizes = [1, 512], strides = [1, 1]} : vector<2x512xf32> to vector<1x512xf32>
    %29 = vector.broadcast %28 : vector<1x512xf32> to vector<8x512xf32>
    %30 = arith.mulf %17, %29 : vector<8x512xf32>
    %cst_17 = arith.constant dense<0.000000e+00> : vector<8xf32>
    %31 = vector.multi_reduction <add>, %30, %cst_17 [1] : vector<8x512xf32> to vector<8xf32>
    %32 = vector.extract_strided_slice %19 {offsets = [0, 1], sizes = [1, 1], strides = [1, 1]} : vector<1x2xf32> to vector<1x1xf32>
    %33 = vector.extract %32[0, 0] : f32 from vector<1x1xf32>
    %34 = vector.broadcast %33 : f32 to vector<8xf32>
    %35 = arith.addf %31, %34 : vector<8xf32>
    %c0_18 = arith.constant 0 : index
    %c0_19 = arith.constant 0 : index
    %36 = vector.load %arg8[%c0_18, %c0_19] : memref<2x8xf32, #tpu.memory_space<vmem>>, vector<1x8xf32>
    %37 = vector.shape_cast %36 : vector<1x8xf32> to vector<8xf32>
    %38 = vector.shape_cast %27 : vector<8xf32> to vector<1x8xf32>
    tpu.vector_store %arg8[%c0_18, %c0_19], %38 {strides = array<i32>} : memref<2x8xf32, #tpu.memory_space<vmem>>, vector<1x8xf32>,
    %c1 = arith.constant 1 : index
    %c0_20 = arith.constant 0 : index
    %39 = vector.load %arg8[%c1, %c0_20] : memref<2x8xf32, #tpu.memory_space<vmem>>, vector<1x8xf32>
    %40 = vector.shape_cast %39 : vector<1x8xf32> to vector<8xf32>
    %41 = vector.shape_cast %35 : vector<8xf32> to vector<1x8xf32>
    tpu.vector_store %arg8[%c1, %c0_20], %41 {strides = array<i32>} : memref<2x8xf32, #tpu.memory_space<vmem>>, vector<1x8xf32>,
    return
  }
  func.func @transform_0(%arg0: i32) -> (i32, i32) {
    %c0_i32 = arith.constant 0 : i32
    %c0_i32_0 = arith.constant 0 : i32
    return %arg0, %c0_i32 : i32, i32
  }
  func.func @transform_1(%arg0: i32) -> (i32, i32) {
    %c0_i32 = arith.constant 0 : i32
    %c0_i32_0 = arith.constant 0 : i32
    %c0_i32_1 = arith.constant 0 : i32
    return %c0_i32, %c0_i32_0 : i32, i32
  }
  func.func @transform_2(%arg0: i32) -> (i32, i32) {
    %c0_i32 = arith.constant 0 : i32
    %c0_i32_0 = arith.constant 0 : i32
    %c0_i32_1 = arith.constant 0 : i32
    return %c0_i32, %c0_i32_0 : i32, i32
  }
  func.func @transform_3(%arg0: i32) -> (i32, i32) {
    %c0_i32 = arith.constant 0 : i32
    %c0_i32_0 = arith.constant 0 : i32
    %c0_i32_1 = arith.constant 0 : i32
    return %c0_i32, %c0_i32_0 : i32, i32
  }
  func.func @transform_4(%arg0: i32) -> (i32, i32) {
    %c0_i32 = arith.constant 0 : i32
    %c0_i32_0 = arith.constant 0 : i32
    %c0_i32_1 = arith.constant 0 : i32
    return %c0_i32, %c0_i32_0 : i32, i32
  }
  func.func @transform_5(%arg0: i32) -> (i32, i32) {
    %c0_i32 = arith.constant 0 : i32
    %c0_i32_0 = arith.constant 0 : i32
    %c0_i32_1 = arith.constant 0 : i32
    return %c0_i32, %c0_i32_0 : i32, i32
  }
  func.func @transform_6(%arg0: i32) -> (i32, i32) {
    %c0_i32 = arith.constant 0 : i32
    %c0_i32_0 = arith.constant 0 : i32
    %c0_i32_1 = arith.constant 0 : i32
    return %c0_i32, %c0_i32_0 : i32, i32
  }
  func.func @transform_7(%arg0: i32) -> (i32, i32) {
    %c0_i32 = arith.constant 0 : i32
    %c0_i32_0 = arith.constant 0 : i32
    return %c0_i32, %arg0 : i32, i32
  }
}

</mosaic_0001>

<bundles_post_ra>
// kernel: _mlp_pallas.1
= control target key start
LH: loop header
LB: loop body
LE: loop exit
PB: predicated region body
PF: predicated region fallthrough
CT: control target
= control target key end

     0   :  { %12 = vsyncpa [#allocation3], 0  ;;  %s2114_s0 = inlined_call_operand.hbm [shape: f32[8,2], index: 0, kind: input, shape index: {}]   ;;  %s2115_s1 = inlined_call_operand.hbm [shape: f32[2,512], index: 1, kind: input, shape index: {}]   ;;  %s2116_s2 = inlined_call_operand.hbm [shape: f32[1,512], index: 2, kind: input, shape index: {}]   ;;  %s2117_s3 = inlined_call_operand.hbm [shape: bf16[512,512], index: 3, kind: input, shape index: {}]   ;;  %s2118_s4 = inlined_call_operand.hbm [shape: f32[1,512], index: 4, kind: input, shape index: {}]   ;;  %s2119_s5 = inlined_call_operand.hbm [shape: f32[2,512], index: 5, kind: input, shape index: {}]   ;;  %s2120_s6 = inlined_call_operand.hbm [shape: f32[1,2], index: 6, kind: input, shape index: {}]   ;;  %s2121_s7 = inlined_call_operand.hbm [shape: f32[2,8], index: 7, kind: output, shape index: {}]  }
   0x1   :  { %13 = vsyncpa [#allocation6], 0 }
   0x2   :  { %14 = vsyncpa [#allocation9], 0 }
   0x3   :  { %15 = vsyncpa [#allocation12], 0 }
   0x4   :  { %16 = vsyncpa [#allocation4], 0  ;;  %s1903_s24 = smov [#allocation5]   ;;  %s1904_s26 = smov [#allocation8]  }
   0x5   :  { %s33_s25 = sshll.u32 %s1903_s24, 4  ;;  %s52_s27 = sshll.u32 %s1904_s26, 4  ;;  %s34_s25 = int_to_ptr.vmem [resolvable:$true] %s33_s25  ;;  %s1956_s27 = int_to_ptr.vmem [resolvable:$true] %s52_s27 }
   0x6   :  { %s1717_s30 = scalar_lea.hbm %s2115_s1, 128 }
   0x7   :  { %p1718_p0 = scmp.ne.s32.totalorder %s2115_s1, %s1717_s30  ;;  %p1721_p1 = scmp.lt.u32.totalorder %s1717_s30, %s2115_s1 }
   0x9   :  { %p1723_p2 = pnand %p1721_p1, %p1718_p0 }
   0xb   :  { %1726 = shalt.err (!%p1723_p2)
}
   0xc   :  { %s1727_s12 = scalar_lea.vmem %s34_s25, 128  ;;  %p1732_p4 = scmp.lt.s32.totalorder %s34_s25, %s34_s25 }
   0xd   :  { %p1728_p3 = scmp.ne.s32.totalorder %s34_s25, %s1727_s12  ;;  %p1733_p5 = scmp.lt.s32.totalorder %s1727_s12, %s1727_s12 }
   0xf   :  { %p1734_p6 = por %p1733_p5, %p1732_p4 }
  0x11   :  { %p1735_p7 = pnand %p1734_p6, %p1728_p3 }
  0x13   :  { %1738 = shalt.err (!%p1735_p7)
}
  0x14   :  { %36 = dma.hbm_to_vmem [thread:$0]  %s2115_s1, 128, %s34_s25, [#allocation6]  }
  0x15   :  { %s1739_s17 = scalar_lea.hbm %s2117_s3, 16384 }
  0x16   :  { %p1740_p8 = scmp.ne.s32.totalorder %s2117_s3, %s1739_s17  ;;  %p1743_p9 = scmp.lt.u32.totalorder %s1739_s17, %s2117_s3 }
  0x18   :  { %p1745_p10 = pnand %p1743_p9, %p1740_p8 }
  0x1a   :  { %1748 = shalt.err (!%p1745_p10)
}
  0x1b   :  { %s1749_s22 = scalar_lea.vmem %s1956_s27, 16384  ;;  %p1754_p12 = scmp.lt.s32.totalorder %s1956_s27, %s1956_s27 }
  0x1c   :  { %p1750_p11 = scmp.ne.s32.totalorder %s1956_s27, %s1749_s22  ;;  %p1755_p13 = scmp.lt.s32.totalorder %s1749_s22, %s1749_s22 }
  0x1e   :  { %p1756_p0 = por %p1755_p13, %p1754_p12 }
  0x20   :  { %p1757_p1 = pnand %p1756_p0, %p1750_p11 }
  0x22   :  { %1760 = shalt.err (!%p1757_p1)
}
  0x23   :  { %s1905_s1 = smov 256   ;;  %s1906_s23 = smov 16  }
  0x24   :  { %58 = dma.hbm_to_vmem [thread:$0]  %s2117_s3, 16384, %s1956_s27, [#allocation9], %s1905_s1, %s1905_s1, %s1906_s23  }
  0x25   :  { %s1907_s26 = smov [#allocation11]   ;;  %s1908_s29 = smov [#allocation2]  }
  0x26   :  { %s75_s28 = sshll.u32 %s1907_s26, 4  ;;  %s23_s30 = sshll.u32 %s1908_s29, 4  ;;  %s76_s28 = int_to_ptr.vmem [resolvable:$true] %s75_s28  ;;  %s24_s30 = int_to_ptr.vmem [resolvable:$true] %s23_s30 }
  0x27   :  { %s1761_s10 = scalar_lea.hbm %s2119_s5, 128 }
  0x28   :  { %p1762_p2 = scmp.ne.s32.totalorder %s2119_s5, %s1761_s10  ;;  %p1765_p3 = scmp.lt.u32.totalorder %s1761_s10, %s2119_s5 }
  0x2a   :  { %p1767_p4 = pnand %p1765_p3, %p1762_p2 }
  0x2c   :  { %1770 = shalt.err (!%p1767_p4)
}
  0x2d   :  { %s1771_s3 = scalar_lea.vmem %s76_s28, 128  ;;  %p1776_p6 = scmp.lt.s32.totalorder %s76_s28, %s76_s28 }
  0x2e   :  { %p1772_p5 = scmp.ne.s32.totalorder %s76_s28, %s1771_s3  ;;  %p1777_p7 = scmp.lt.s32.totalorder %s1771_s3, %s1771_s3 }
  0x30   :  { %p1778_p8 = por %p1777_p7, %p1776_p6 }
  0x32   :  { %p1779_p9 = pnand %p1778_p8, %p1772_p5 }
  0x34   :  { %1782 = shalt.err (!%p1779_p9)
}
  0x35   :  { %78 = dma.hbm_to_vmem [thread:$0]  %s2119_s5, 128, %s76_s28, [#allocation12]  }
  0x36   :  { %s1783_s18 = scalar_lea.hbm %s2114_s0, 128 }
  0x37   :  { %p1784_p10 = scmp.ne.s32.totalorder %s2114_s0, %s1783_s18  ;;  %p1787_p11 = scmp.lt.u32.totalorder %s1783_s18, %s2114_s0 }
  0x39   :  { %p1789_p12 = pnand %p1787_p11, %p1784_p10 }
  0x3b   :  { %1792 = shalt.err (!%p1789_p12)
}
  0x3c   :  { %s1793_s1 = scalar_lea.vmem %s24_s30, 128  ;;  %p1798_p0 = scmp.lt.s32.totalorder %s24_s30, %s24_s30 }
  0x3d   :  { %p1794_p13 = scmp.ne.s32.totalorder %s24_s30, %s1793_s1  ;;  %p1799_p1 = scmp.lt.s32.totalorder %s1793_s1, %s1793_s1 }
  0x3f   :  { %p1800_p2 = por %p1799_p1, %p1798_p0 }
  0x41   :  { %p1801_p3 = pnand %p1800_p2, %p1794_p13 }
  0x43   :  { %1804 = shalt.err (!%p1801_p3)
}
  0x44   :  { %26 = dma.hbm_to_vmem [thread:$0]  %s2114_s0, 128, %s24_s30, [#allocation3]  }
  0x45   :  { %s1909_s24 = smov [#allocation7]   ;;  %s1910_s26 = smov [#allocation10]  }
  0x46   :  { %s43_s25 = sshll.u32 %s1909_s24, 4  ;;  %s65_s28 = sshll.u32 %s1910_s26, 4  ;;  %s44_s25 = int_to_ptr.vmem [resolvable:$true] %s43_s25  ;;  %s66_s28 = int_to_ptr.vmem [resolvable:$true] %s65_s28 }
  0x47   :  { %s1805_s9 = scalar_lea.hbm %s2116_s2, 64 }
  0x48   :  { %p1806_p4 = scmp.ne.s32.totalorder %s2116_s2, %s1805_s9  ;;  %p1809_p5 = scmp.lt.u32.totalorder %s1805_s9, %s2116_s2 }
  0x4a   :  { %p1811_p6 = pnand %p1809_p5, %p1806_p4 }
  0x4c   :  { %1814 = shalt.err (!%p1811_p6)
}
  0x4d   :  { %s1815_s0 = scalar_lea.vmem %s44_s25, 64  ;;  %p1820_p8 = scmp.lt.s32.totalorder %s44_s25, %s44_s25 }
  0x4e   :  { %p1816_p7 = scmp.ne.s32.totalorder %s44_s25, %s1815_s0  ;;  %p1821_p9 = scmp.lt.s32.totalorder %s1815_s0, %s1815_s0 }
  0x50   :  { %p1822_p10 = por %p1821_p9, %p1820_p8 }
  0x52   :  { %p1823_p11 = pnand %p1822_p10, %p1816_p7 }
  0x54   :  { %1826 = shalt.err (!%p1823_p11)
}
  0x55   :  { %46 = dma.hbm_to_vmem [thread:$0]  %s2116_s2, 64, %s44_s25, [#allocation6]  }
  0x56   :  { %s1827_s15 = scalar_lea.hbm %s2118_s4, 64 }
  0x57   :  { %p1828_p12 = scmp.ne.s32.totalorder %s2118_s4, %s1827_s15  ;;  %p1831_p13 = scmp.lt.u32.totalorder %s1827_s15, %s2118_s4 }
  0x59   :  { %p1833_p0 = pnand %p1831_p13, %p1828_p12 }
  0x5b   :  { %1836 = shalt.err (!%p1833_p0)
}
  0x5c   :  { %s1837_s20 = scalar_lea.vmem %s66_s28, 64  ;;  %p1842_p2 = scmp.lt.s32.totalorder %s66_s28, %s66_s28 }
  0x5d   :  { %p1838_p1 = scmp.ne.s32.totalorder %s66_s28, %s1837_s20  ;;  %p1843_p3 = scmp.lt.s32.totalorder %s1837_s20, %s1837_s20 }
  0x5f   :  { %p1844_p4 = por %p1843_p3, %p1842_p2 }
  0x61   :  { %p1845_p5 = pnand %p1844_p4, %p1838_p1 }
  0x63   :  { %1848 = shalt.err (!%p1845_p5)
}
  0x64   :  { %68 = dma.hbm_to_vmem [thread:$0]  %s2118_s4, 64, %s66_s28, [#allocation9]  }
  0x65   :  { %s1911_s22 = smov [#allocation13]   ;;  %s1849_s24 = scalar_lea.hbm %s2120_s6, 16 }
  0x66   :  { %s85_s1 = sshll.u32 %s1911_s22, 4  ;;  %p1850_p6 = scmp.ne.s32.totalorder %s2120_s6, %s1849_s24  ;;  %s86_s1 = int_to_ptr.vmem [resolvable:$true] %s85_s1 }
  0x67   :  { %p1853_p7 = scmp.lt.u32.totalorder %s1849_s24, %s2120_s6 }
  0x69   :  { %p1855_p8 = pnand %p1853_p7, %p1850_p6 }
  0x6b   :  { %1858 = shalt.err (!%p1855_p8)
}
  0x6c   :  { %s1859_s9 = scalar_lea.vmem %s86_s1, 16  ;;  %s1863_s4 = scalar_lea.vmem %s86_s1, 32 }
  0x6d   :  { %p1860_p9 = scmp.ne.s32.totalorder %s86_s1, %s1859_s9  ;;  %p1864_p10 = scmp.lt.s32.totalorder %s86_s1, %s86_s1 }
  0x6e   :  { %p1865_p11 = scmp.lt.s32.totalorder %s1863_s4, %s1859_s9 }
  0x70   :  { %p1866_p12 = por %p1865_p11, %p1864_p10 }
  0x72   :  { %p1867_p13 = pnand %p1866_p12, %p1860_p9 }
  0x74   :  { %1870 = shalt.err (!%p1867_p13)
}
  0x75   :  { %88 = dma.hbm_to_vmem [thread:$0]  %s2120_s6, 16, %s86_s1, [#allocation12]  }
  0x76   :  { %1893 = dma.done.wait [#allocation3], 128  }
  0x77   :  { %1894 = vsyncadd [#allocation3], 4294967168 }
  0x78   :  { %1895 = dma.done.wait [#allocation6], 192  }
  0x79   :  { %1896 = vsyncadd [#allocation6], 4294967104 }
  0x7a   :  { %1897 = dma.done.wait [#allocation9], 16448  }
  0x7b   :  { %1898 = vsyncadd [#allocation9], 4294950848 }
  0x7c   :  { %1899 = dma.done.wait [#allocation12], 144  }
  0x7d   :  { %1900 = vsyncadd [#allocation12], 4294967152  ;;  %v120_v0 = vlaneseq  ;;  %v1912_v1 = vmov 1983009808   ;;  %v1913_v3 = vmov 0   ;;  %v114_v7 = vld [vmem:[#allocation5] sm:$0xff] }
  0x7e   :  { %v118_v2 = vunpack.c.l.s4 %v1912_v1  ;;  %211 = vmatprep.mubr.bf16.mxu0 %v1913_v3  ;;  %252 = vmatprep.mubr.bf16.mxu1 %v1913_v3  ;;  %v116_v9 = vcombine.high %v114_v7, %v114_v7  ;;  %vm166_vm0 = vcmask 1040384   ;;  %v111_v13 = vld [vmem:[#allocation2] sm:$0xff]  ;;  %v1527_v18 = vld [vmem:[#allocation8 + $0x4] ss:$16 sps:$4 sm:$0xff]   ;;  %vm162_vm1 = vcmask 15360   ;;  %s1914_s6 = smov 127  }
  0x7f   :  { %v2048_v4 = vshrl.u32 %v120_v0, 7  ;;  %v113_v19 = vpack.c.bf16 %v111_v13, %v111_v13  ;;  %v1530_v22 = vld [vmem:[#allocation8 + $0xc] ss:$16 sps:$4 sm:$0xff]   ;;  %v1525_v23 = vld [vmem:[#allocation8] ss:$16 sps:$4 sm:$0xff]   ;;  %s1915_s13 = smov [#allocation14]  }
  0x80   :  { %v119_v5 = vunpack.c.0.s8 %v118_v2  ;;  %v1533_v24 = vld [vmem:[#allocation8 + $0x24] ss:$16 sps:$4 sm:$0xff]   ;;  %v1528_v25 = vld [vmem:[#allocation8 + $0x8] ss:$16 sps:$4 sm:$0xff]   ;;  %v1536_v26 = vld [vmem:[#allocation8 + $0x2c] ss:$16 sps:$4 sm:$0xff]  }
  0x81   :  { %v1531_v27 = vld [vmem:[#allocation8 + $0x20] ss:$16 sps:$4 sm:$0xff]   ;;  %v1539_v28 = vld [vmem:[#allocation8 + $0x44] ss:$16 sps:$4 sm:$0xff]   ;;  %v1534_v29 = vld [vmem:[#allocation8 + $0x28] ss:$16 sps:$4 sm:$0xff]  }
  0x82   :  { %v122_v6 = vsub.s32 %v119_v5, %v2048_v4  ;;  %v1542_v30 = vld [vmem:[#allocation8 + $0x4c] ss:$16 sps:$4 sm:$0xff]   ;;  %v1537_v31 = vld [vmem:[#allocation8 + $0x40] ss:$16 sps:$4 sm:$0xff]   ;;  %v1545_v32 = vld [vmem:[#allocation8 + $0x64] ss:$16 sps:$4 sm:$0xff]  }
  0x83   :  { %v1540_v33 = vld [vmem:[#allocation8 + $0x48] ss:$16 sps:$4 sm:$0xff]   ;;  %v1548_v34 = vld [vmem:[#allocation8 + $0x6c] ss:$16 sps:$4 sm:$0xff]   ;;  %v1543_v35 = vld [vmem:[#allocation8 + $0x60] ss:$16 sps:$4 sm:$0xff]  }
  0x84   :  { %v123_v8 = vrot.slane %v114_v7, %v122_v6  ;;  %v130_v12 = vrot.slane %v116_v9, %v122_v6  ;;  %v1551_v36 = vld [vmem:[#allocation8 + $0x84] ss:$16 sps:$4 sm:$0xff]   ;;  %v1546_v37 = vld [vmem:[#allocation8 + $0x68] ss:$16 sps:$4 sm:$0xff]   ;;  %v1554_v38 = vld [vmem:[#allocation8 + $0x8c] ss:$16 sps:$4 sm:$0xff]  }
  0x85   :  { %v1549_v39 = vld [vmem:[#allocation8 + $0x80] ss:$16 sps:$4 sm:$0xff]   ;;  %v1557_v40 = vld [vmem:[#allocation8 + $0xa4] ss:$16 sps:$4 sm:$0xff]   ;;  %v1552_v41 = vld [vmem:[#allocation8 + $0x88] ss:$16 sps:$4 sm:$0xff]  }
  0x86   :  { %v131_v10 = vcombine.high %v123_v8, %v123_v8  ;;  %v137_v11 = vpack.c.bf16 %v123_v8, %v123_v8  ;;  %v132_v16 = vcombine.high %v130_v12, %v130_v12  ;;  %v139_v17 = vpack.c.bf16 %v130_v12, %v130_v12  ;;  %v1560_v42 = vld [vmem:[#allocation8 + $0xac] ss:$16 sps:$4 sm:$0xff]   ;;  %v1555_v43 = vld [vmem:[#allocation8 + $0xa0] ss:$16 sps:$4 sm:$0xff]   ;;  %v1563_v44 = vld [vmem:[#allocation8 + $0xc4] ss:$16 sps:$4 sm:$0xff]  }
  0x87   :  { %v1558_v45 = vld [vmem:[#allocation8 + $0xa8] ss:$16 sps:$4 sm:$0xff]   ;;  %v1566_v46 = vld [vmem:[#allocation8 + $0xcc] ss:$16 sps:$4 sm:$0xff]   ;;  %v1561_v47 = vld [vmem:[#allocation8 + $0xc0] ss:$16 sps:$4 sm:$0xff]  }
  0x88   :  { %v138_v14 = vpack.c.bf16 %v131_v10, %v131_v10  ;;  %v168_v15 = vsel %vm166_vm0, %v137_v11, 0  ;;  %v140_v20 = vpack.c.bf16 %v132_v16, %v132_v16  ;;  %v174_v21 = vsel %vm166_vm0, %v139_v17, 0  ;;  %v1569_v48 = vld [vmem:[#allocation8 + $0xe4] ss:$16 sps:$4 sm:$0xff]   ;;  %v1564_v49 = vld [vmem:[#allocation8 + $0xc8] ss:$16 sps:$4 sm:$0xff]  }
  0x89   :  { %v1572_v50 = vld [vmem:[#allocation8 + $0xec] ss:$16 sps:$4 sm:$0xff]   ;;  %v1567_v51 = vld [vmem:[#allocation8 + $0xe0] ss:$16 sps:$4 sm:$0xff]   ;;  %v1570_v52 = vld [vmem:[#allocation8 + $0xe8] ss:$16 sps:$4 sm:$0xff]  }
  0x8a   :  { %1363 = vmatprep.subr.msk.bf16.mxu0 %vm166_vm0, %v138_v14  ;;  %1365 = vmatprep.subr.msk.bf16.mxu1 %vm166_vm0, %v140_v20  ;;  %v1575_v53 = vld [vmem:[#allocation8 + $0x104] ss:$16 sps:$4 sm:$0xff]   ;;  %v1573_v54 = vld [vmem:[#allocation8 + $0x100] ss:$16 sps:$4 sm:$0xff]   ;;  %v1578_v55 = vld [vmem:[#allocation8 + $0x10c] ss:$16 sps:$4 sm:$0xff]  }
  0x8b   :  { %180 = vmatpush1.bf16.msra.mxu0 %v168_v15  ;;  %221 = vmatpush1.bf16.msra.mxu1 %v174_v21  ;;  %v1581_v56 = vld [vmem:[#allocation8 + $0x124] ss:$16 sps:$4 sm:$0xff]   ;;  %v1576_v57 = vld [vmem:[#allocation8 + $0x108] ss:$16 sps:$4 sm:$0xff]   ;;  %v1584_v58 = vld [vmem:[#allocation8 + $0x12c] ss:$16 sps:$4 sm:$0xff]  }
  0x8c   :  { %1059 = vmatprep.subr.bf16.mxu0 %v1527_v18  ;;  %1141 = vmatprep.subr.bf16.mxu1 %v1530_v22  ;;  %v1579_v59 = vld [vmem:[#allocation8 + $0x120] ss:$16 sps:$4 sm:$0xff]   ;;  %v1587_v60 = vld [vmem:[#allocation8 + $0x144] ss:$16 sps:$4 sm:$0xff]   ;;  %v1582_v61 = vld [vmem:[#allocation8 + $0x128] ss:$16 sps:$4 sm:$0xff]  }
  0x8d   :  { %v1590_v62 = vld [vmem:[#allocation8 + $0x14c] ss:$16 sps:$4 sm:$0xff]   ;;  %v1585_v63 = vld [vmem:[#allocation8 + $0x140] ss:$16 sps:$4 sm:$0xff]   ;;  %v1593_v1 = vld [vmem:[#allocation8 + $0x164] ss:$16 sps:$4 sm:$0xff]  }
  0x8e   :  { %1364 = vmatmul.mubr.msk.bf16.vlgmr.msra.gmra.mrb[0].mxu0 %vm162_vm1, %v113_v19  ;;  %1366 = vmatmul.mubr.msk.bf16.vlgmr.msra.gmra.mrb[0].mxu1 %vm162_vm1, %v113_v19  ;;  %v1588_v2 = vld [vmem:[#allocation8 + $0x148] ss:$16 sps:$4 sm:$0xff]   ;;  %v1596_v3 = vld [vmem:[#allocation8 + $0x16c] ss:$16 sps:$4 sm:$0xff]   ;;  %v1591_v5 = vld [vmem:[#allocation8 + $0x160] ss:$16 sps:$4 sm:$0xff]  }
  0x8f   :  { %1060 = vmatpush1.bf16.msra.mxu0 %v1525_v23  ;;  %1142 = vmatpush1.bf16.msra.mxu1 %v1528_v25  ;;  %v1599_v6 = vld [vmem:[#allocation8 + $0x184] ss:$16 sps:$4 sm:$0xff]   ;;  %v1594_v7 = vld [vmem:[#allocation8 + $0x168] ss:$16 sps:$4 sm:$0xff]   ;;  %v1602_v8 = vld [vmem:[#allocation8 + $0x18c] ss:$16 sps:$4 sm:$0xff]  }
  0x90   :  { %1061 = vmatprep.subr.bf16.mxu0 %v1533_v24  ;;  %1143 = vmatprep.subr.bf16.mxu1 %v1536_v26  ;;  %v1597_v9 = vld [vmem:[#allocation8 + $0x180] ss:$16 sps:$4 sm:$0xff]   ;;  %v1605_v10 = vld [vmem:[#allocation8 + $0x1a4] ss:$16 sps:$4 sm:$0xff]   ;;  %v1600_v11 = vld [vmem:[#allocation8 + $0x188] ss:$16 sps:$4 sm:$0xff]  }
  0x91   :  { %v1608_v12 = vld [vmem:[#allocation8 + $0x1ac] ss:$16 sps:$4 sm:$0xff]   ;;  %v1603_v13 = vld [vmem:[#allocation8 + $0x1a0] ss:$16 sps:$4 sm:$0xff]   ;;  %v1606_v14 = vld [vmem:[#allocation8 + $0x1a8] ss:$16 sps:$4 sm:$0xff]  }
  0x92   :  { %v1611_v15 = vld [vmem:[#allocation8 + $0x1c4] ss:$16 sps:$4 sm:$0xff]   ;;  %v1614_v16 = vld [vmem:[#allocation8 + $0x1cc] ss:$16 sps:$4 sm:$0xff]   ;;  %v1609_v17 = vld [vmem:[#allocation8 + $0x1c0] ss:$16 sps:$4 sm:$0xff]  }
  0x93   :  { %1062 = vmatpush1.bf16.msra.mxu0 %v1531_v27  ;;  %1144 = vmatpush1.bf16.msra.mxu1 %v1534_v29  ;;  %v1612_v18 = vld [vmem:[#allocation8 + $0x1c8] ss:$16 sps:$4 sm:$0xff]   ;;  %v1617_v19 = vld [vmem:[#allocation8 + $0x1e4] ss:$16 sps:$4 sm:$0xff]   ;;  %v1620_v20 = vld [vmem:[#allocation8 + $0x1ec] ss:$16 sps:$4 sm:$0xff]  }
  0x94   :  { %1063 = vmatprep.subr.bf16.mxu0 %v1539_v28  ;;  %1145 = vmatprep.subr.bf16.mxu1 %v1542_v30  ;;  %v1615_v21 = vld [vmem:[#allocation8 + $0x1e0] ss:$16 sps:$4 sm:$0xff]   ;;  %v1618_v22 = vld [vmem:[#allocation8 + $0x1e8] ss:$16 sps:$4 sm:$0xff]   ;;  %v1623_v23 = vld [vmem:[#allocation8 + $0x204] ss:$16 sps:$4 sm:$0xff]  }
  0x95   :  { %v1626_v24 = vld [vmem:[#allocation8 + $0x20c] ss:$16 sps:$4 sm:$0xff]   ;;  %v2056_v26 = vsub.s32 0, %v2048_v4  ;;  %v2061_v28 = vsub.s32 1, %v2048_v4  ;;  %v2064_v29 = vsub.s32 3, %v2048_v4  ;;  %s1351_s0 = sshll.u32 %s1915_s13, 4  ;;  %s1352_s0 = int_to_ptr.vmem [resolvable:$true] %s1351_s0 }
  0x96   :  { %v1228_v25 = vld [vmem:[#allocation13] sm:$0x1]  ;;  %v2058_v27 = vld [vmem:[#allocation7] sm:$0xf]  ;;  %vm1336_vm2 = vcmask 57344   ;;  %s1871_s30 = scalar_lea.vmem %s1352_s0, 32  ;;  %p1876_p1 = scmp.lt.s32.totalorder %s1352_s0, %s1352_s0 }
  0x97   :  { %1064 = vmatpush1.bf16.msra.mxu0 %v1537_v31  ;;  %1146 = vmatpush1.bf16.msra.mxu1 %v1540_v33  ;;  %1507 = vpush %v1228_v25  ;;  %v145_v30 = vrot.slane %v2058_v27, %v2056_v26  ;;  %v149_v31 = vrot.slane %v2058_v27, %v2061_v28  ;;  %p1872_p0 = scmp.ne.s32.totalorder %s1352_s0, %s1871_s30  ;;  %p1877_p2 = scmp.lt.s32.totalorder %s1871_s30, %s1871_s30 }
  0x98   :  { %1065 = vmatprep.subr.bf16.mxu0 %v1545_v32  ;;  %1147 = vmatprep.subr.bf16.mxu1 %v1548_v34  ;;  %v157_v33 = vrot.slane %v2058_v27, %v2064_v29 }
  0x99   :  { %1323 = vrot.lane.b32.xlu0 %v1228_v25, %s1914_s6  ;;  %v1678_v25 = vld [vmem:[#allocation8 + $0x328] ss:$16 sps:$4 sm:$0xff]   ;;  %p1878_p3 = por %p1877_p2, %p1876_p1 }
  0x9b   :  { %1066 = vmatpush1.bf16.msra.mxu0 %v1543_v35  ;;  %1148 = vmatpush1.bf16.msra.mxu1 %v1546_v37  ;;  %p1879_p4 = pnand %p1878_p3, %p1872_p0 }
  0x9c   :  { %1067 = vmatprep.subr.bf16.mxu0 %v1551_v36  ;;  %1149 = vmatprep.subr.bf16.mxu1 %v1554_v38 }
  0x9f   :  { %1068 = vmatpush1.bf16.msra.mxu0 %v1549_v39  ;;  %1150 = vmatpush1.bf16.msra.mxu1 %v1552_v41 }
  0xa0   :  { %1069 = vmatprep.subr.bf16.mxu0 %v1557_v40  ;;  %1151 = vmatprep.subr.bf16.mxu1 %v1560_v42 }
  0xa3   :  { %1070 = vmatpush1.bf16.msra.mxu0 %v1555_v43  ;;  %1152 = vmatpush1.bf16.msra.mxu1 %v1558_v45 }
  0xa4   :  { %1071 = vmatprep.subr.bf16.mxu0 %v1563_v44  ;;  %1153 = vmatprep.subr.bf16.mxu1 %v1566_v46 }
  0xa7   :  { %1072 = vmatpush1.bf16.msra.mxu0 %v1561_v47  ;;  %1154 = vmatpush1.bf16.msra.mxu1 %v1564_v49  ;;  %v1621_v47 = vld [vmem:[#allocation8 + $0x200] ss:$16 sps:$4 sm:$0xff]  }
  0xa8   :  { %1073 = vmatprep.subr.bf16.mxu0 %v1569_v48  ;;  %1155 = vmatprep.subr.bf16.mxu1 %v1572_v50  ;;  %v1624_v48 = vld [vmem:[#allocation8 + $0x208] ss:$16 sps:$4 sm:$0xff]  }
  0xab   :  { %1074 = vmatpush1.bf16.msra.mxu0 %v1567_v51  ;;  %1156 = vmatpush1.bf16.msra.mxu1 %v1570_v52  ;;  %v1629_v51 = vld [vmem:[#allocation8 + $0x224] ss:$16 sps:$4 sm:$0xff]   ;;  %v1632_v52 = vld [vmem:[#allocation8 + $0x22c] ss:$16 sps:$4 sm:$0xff]  }
  0xac   :  { %1075 = vmatprep.subr.bf16.mxu0 %v1575_v53  ;;  %1157 = vmatprep.subr.bf16.mxu1 %v1578_v55  ;;  %v1630_v55 = vld [vmem:[#allocation8 + $0x228] ss:$16 sps:$4 sm:$0xff]  }
  0xaf   :  { %1076 = vmatpush1.bf16.msra.mxu0 %v1573_v54  ;;  %1158 = vmatpush1.bf16.msra.mxu1 %v1576_v57  ;;  %v1627_v54 = vld [vmem:[#allocation8 + $0x220] ss:$16 sps:$4 sm:$0xff]   ;;  %v1638_v57 = vld [vmem:[#allocation8 + $0x24c] ss:$16 sps:$4 sm:$0xff]  }
  0xb0   :  { %1077 = vmatprep.subr.bf16.mxu0 %v1581_v56  ;;  %1159 = vmatprep.subr.bf16.mxu1 %v1584_v58  ;;  %v1635_v56 = vld [vmem:[#allocation8 + $0x244] ss:$16 sps:$4 sm:$0xff]   ;;  %v1633_v58 = vld [vmem:[#allocation8 + $0x240] ss:$16 sps:$4 sm:$0xff]  }
  0xb3   :  { %1078 = vmatpush1.bf16.msra.mxu0 %v1579_v59  ;;  %1160 = vmatpush1.bf16.msra.mxu1 %v1582_v61  ;;  %v1636_v59 = vld [vmem:[#allocation8 + $0x248] ss:$16 sps:$4 sm:$0xff]   ;;  %v1644_v61 = vld [vmem:[#allocation8 + $0x26c] ss:$16 sps:$4 sm:$0xff]  }
  0xb4   :  { %1079 = vmatprep.subr.bf16.mxu0 %v1587_v60  ;;  %1161 = vmatprep.subr.bf16.mxu1 %v1590_v62  ;;  %v1641_v60 = vld [vmem:[#allocation8 + $0x264] ss:$16 sps:$4 sm:$0xff]   ;;  %v1639_v62 = vld [vmem:[#allocation8 + $0x260] ss:$16 sps:$4 sm:$0xff]  }
  0xb7   :  { %1080 = vmatpush1.bf16.msra.mxu0 %v1585_v63  ;;  %1162 = vmatpush1.bf16.msra.mxu1 %v1588_v2  ;;  %v1642_v63 = vld [vmem:[#allocation8 + $0x268] ss:$16 sps:$4 sm:$0xff]   ;;  %v1650_v2 = vld [vmem:[#allocation8 + $0x28c] ss:$16 sps:$4 sm:$0xff]  }
  0xb8   :  { %1081 = vmatprep.subr.bf16.mxu0 %v1593_v1  ;;  %1163 = vmatprep.subr.bf16.mxu1 %v1596_v3  ;;  %v1647_v1 = vld [vmem:[#allocation8 + $0x284] ss:$16 sps:$4 sm:$0xff]   ;;  %v1645_v3 = vld [vmem:[#allocation8 + $0x280] ss:$16 sps:$4 sm:$0xff]  }
  0xbb   :  { %1082 = vmatpush1.bf16.msra.mxu0 %v1591_v5  ;;  %1164 = vmatpush1.bf16.msra.mxu1 %v1594_v7  ;;  %v1648_v5 = vld [vmem:[#allocation8 + $0x288] ss:$16 sps:$4 sm:$0xff]   ;;  %v1656_v7 = vld [vmem:[#allocation8 + $0x2ac] ss:$16 sps:$4 sm:$0xff]  }
  0xbc   :  { %1083 = vmatprep.subr.bf16.mxu0 %v1599_v6  ;;  %1165 = vmatprep.subr.bf16.mxu1 %v1602_v8  ;;  %v1653_v6 = vld [vmem:[#allocation8 + $0x2a4] ss:$16 sps:$4 sm:$0xff]   ;;  %v1651_v8 = vld [vmem:[#allocation8 + $0x2a0] ss:$16 sps:$4 sm:$0xff]  }
  0xbf   :  { %1084 = vmatpush1.bf16.msra.mxu0 %v1597_v9  ;;  %1166 = vmatpush1.bf16.msra.mxu1 %v1600_v11  ;;  %v1654_v9 = vld [vmem:[#allocation8 + $0x2a8] ss:$16 sps:$4 sm:$0xff]   ;;  %v1662_v11 = vld [vmem:[#allocation8 + $0x2cc] ss:$16 sps:$4 sm:$0xff]  }
  0xc0   :  { %1085 = vmatprep.subr.bf16.mxu0 %v1605_v10  ;;  %1167 = vmatprep.subr.bf16.mxu1 %v1608_v12  ;;  %v1659_v10 = vld [vmem:[#allocation8 + $0x2c4] ss:$16 sps:$4 sm:$0xff]   ;;  %v1657_v12 = vld [vmem:[#allocation8 + $0x2c0] ss:$16 sps:$4 sm:$0xff]  }
  0xc3   :  { %1086 = vmatpush1.bf16.msra.mxu0 %v1603_v13  ;;  %1168 = vmatpush1.bf16.msra.mxu1 %v1606_v14  ;;  %v1660_v13 = vld [vmem:[#allocation8 + $0x2c8] ss:$16 sps:$4 sm:$0xff]   ;;  %v1665_v14 = vld [vmem:[#allocation8 + $0x2e4] ss:$16 sps:$4 sm:$0xff]  }
  0xc4   :  { %1087 = vmatprep.subr.bf16.mxu0 %v1611_v15  ;;  %1169 = vmatprep.subr.bf16.mxu1 %v1614_v16  ;;  %v1668_v15 = vld [vmem:[#allocation8 + $0x2ec] ss:$16 sps:$4 sm:$0xff]   ;;  %v1663_v16 = vld [vmem:[#allocation8 + $0x2e0] ss:$16 sps:$4 sm:$0xff]  }
  0xc7   :  { %1088 = vmatpush1.bf16.msra.mxu0 %v1609_v17  ;;  %1170 = vmatpush1.bf16.msra.mxu1 %v1612_v18  ;;  %v1666_v17 = vld [vmem:[#allocation8 + $0x2e8] ss:$16 sps:$4 sm:$0xff]   ;;  %v1671_v18 = vld [vmem:[#allocation8 + $0x304] ss:$16 sps:$4 sm:$0xff]  }
  0xc8   :  { %1089 = vmatprep.subr.bf16.mxu0 %v1617_v19  ;;  %1171 = vmatprep.subr.bf16.mxu1 %v1620_v20  ;;  %v1674_v19 = vld [vmem:[#allocation8 + $0x30c] ss:$16 sps:$4 sm:$0xff]   ;;  %v1669_v20 = vld [vmem:[#allocation8 + $0x300] ss:$16 sps:$4 sm:$0xff]   ;;  %s1508_s11 = spop %1507 }
  0xcb   :  { %1090 = vmatpush1.bf16.msra.mxu0 %v1615_v21  ;;  %1172 = vmatpush1.bf16.msra.mxu1 %v1618_v22  ;;  %v1672_v21 = vld [vmem:[#allocation8 + $0x308] ss:$16 sps:$4 sm:$0xff]   ;;  %v1677_v22 = vld [vmem:[#allocation8 + $0x324] ss:$16 sps:$4 sm:$0xff]  }
  0xcc   :  { %1100 = vmatprep.subr.bf16.mxu0 %v1623_v23  ;;  %1182 = vmatprep.subr.bf16.mxu1 %v1626_v24  ;;  %v1680_v23 = vld [vmem:[#allocation8 + $0x32c] ss:$16 sps:$4 sm:$0xff]   ;;  %v1675_v24 = vld [vmem:[#allocation8 + $0x320] ss:$16 sps:$4 sm:$0xff]  }
 0x161   :  { %v213_v32 = vpop.f32.mrb[0].mxu0  ;;  %v2072_v38 = vpop.f32.mrb[0].mxu1 }
 0x162   :  { %v214_v34 = vadd.f32 %v213_v32, %v145_v30  ;;  %v215_v35 = vpop.f32.mrb[1].mxu0  ;;  %v256_v41 = vpop.f32.mrb[1].mxu1  ;;  %v1683_v30 = vld [vmem:[#allocation8 + $0x344] ss:$16 sps:$4 sm:$0xff]   ;;  %v1681_v32 = vld [vmem:[#allocation8 + $0x340] ss:$16 sps:$4 sm:$0xff]  }
 0x163   :  { %v216_v36 = vadd.f32 %v215_v35, %v149_v31  ;;  %v217_v37 = vpop.f32.mrb[2].mxu0  ;;  %v257_v43 = vadd.f32 %v256_v41, %v157_v33  ;;  %v258_v44 = vpop.f32.mrb[2].mxu1  ;;  %v1686_v31 = vld [vmem:[#allocation8 + $0x34c] ss:$16 sps:$4 sm:$0xff]   ;;  %v1684_v33 = vld [vmem:[#allocation8 + $0x348] ss:$16 sps:$4 sm:$0xff]  }
 0x164   :  { %v261_v39 = vmax.f32 %v214_v34, 0.0  ;;  %v218_v40 = vpop.f32.mrb[3].mxu0  ;;  %v259_v45 = vpop.f32.mrb[3].mxu1  ;;  %v1689_v34 = vld [vmem:[#allocation8 + $0x364] ss:$16 sps:$4 sm:$0xff]  }
 0x165   :  { %v262_v42 = vmax.f32 %v216_v36, 0.0  ;;  %v264_v49 = vmax.f32 %v257_v43, 0.0  ;;  %v1692_v35 = vld [vmem:[#allocation8 + $0x36c] ss:$16 sps:$4 sm:$0xff]   ;;  %v1687_v36 = vld [vmem:[#allocation8 + $0x360] ss:$16 sps:$4 sm:$0xff]  }
 0x166   :  { %v265_v50 = vpack.c.bf16 %v261_v39, %v261_v39  ;;  %v1690_v37 = vld [vmem:[#allocation8 + $0x368] ss:$16 sps:$4 sm:$0xff]   ;;  %v1695_v39 = vld [vmem:[#allocation8 + $0x384] ss:$16 sps:$4 sm:$0xff]   ;;  %v1698_v40 = vld [vmem:[#allocation8 + $0x38c] ss:$16 sps:$4 sm:$0xff]  }
 0x167   :  { %v266_v46 = vpack.c.bf16 %v262_v42, %v262_v42  ;;  %v268_v53 = vpack.c.bf16 %v264_v49, %v264_v49  ;;  %v1693_v41 = vld [vmem:[#allocation8 + $0x380] ss:$16 sps:$4 sm:$0xff]   ;;  %v1696_v42 = vld [vmem:[#allocation8 + $0x388] ss:$16 sps:$4 sm:$0xff]   ;;  %v2075_v43 = vsub.s32 2, %v2048_v4 }
 0x168   :  { %v1701_v44 = vld [vmem:[#allocation8 + $0x3a4] ss:$16 sps:$4 sm:$0xff]   ;;  %v1704_v45 = vld [vmem:[#allocation8 + $0x3ac] ss:$16 sps:$4 sm:$0xff]  }
 0x169   :  { %1091 = vmatprep.mubr.bf16.mxu0 %v266_v46  ;;  %1173 = vmatprep.mubr.bf16.mxu1 %v266_v46  ;;  %v1699_v46 = vld [vmem:[#allocation8 + $0x3a0] ss:$16 sps:$4 sm:$0xff]   ;;  %v1707_v49 = vld [vmem:[#allocation8 + $0x3c4] ss:$16 sps:$4 sm:$0xff]  }
 0x16a   :  { %1092 = vmatmul.mubr.bf16.vlgmr.msra.gmra.mrb[4].mxu0 %v265_v50  ;;  %1174 = vmatmul.mubr.bf16.vlgmr.msra.gmra.mrb[4].mxu1 %v265_v50  ;;  %v1710_v50 = vld [vmem:[#allocation8 + $0x3cc] ss:$16 sps:$4 sm:$0xff]  }
 0x16b   :  { %1101 = vmatpush1.bf16.msra.mxu0 %v1621_v47  ;;  %1183 = vmatpush1.bf16.msra.mxu1 %v1624_v48  ;;  %v1702_v47 = vld [vmem:[#allocation8 + $0x3a8] ss:$16 sps:$4 sm:$0xff]   ;;  %v153_v48 = vrot.slane %v2058_v27, %v2075_v43 }
 0x16c   :  { %1102 = vmatprep.subr.bf16.mxu0 %v1629_v51  ;;  %1184 = vmatprep.subr.bf16.mxu1 %v1632_v52  ;;  %v1705_v51 = vld [vmem:[#allocation8 + $0x3c0] ss:$16 sps:$4 sm:$0xff]   ;;  %v1708_v52 = vld [vmem:[#allocation8 + $0x3c8] ss:$16 sps:$4 sm:$0xff]  }
 0x16d   :  { %1132 = vmatprep.mubr.bf16.mxu0 %v268_v53  ;;  %1214 = vmatprep.mubr.bf16.mxu1 %v268_v53  ;;  %v255_v53 = vadd.f32 %v2072_v38, %v153_v48  ;;  %v1227_v38 = vld [vmem:[#allocation11] sm:$0xff] }
 0x16f   :  { %1103 = vmatpush1.bf16.msra.mxu0 %v1627_v54  ;;  %1185 = vmatpush1.bf16.msra.mxu1 %v1630_v55  ;;  %v1713_v54 = vld [vmem:[#allocation8 + $0x3e4] ss:$16 sps:$4 sm:$0xff]   ;;  %v1716_v55 = vld [vmem:[#allocation8 + $0x3ec] ss:$16 sps:$4 sm:$0xff]  }
 0x170   :  { %1104 = vmatprep.subr.bf16.mxu0 %v1635_v56  ;;  %1186 = vmatprep.subr.bf16.mxu1 %v1638_v57  ;;  %v1711_v56 = vld [vmem:[#allocation8 + $0x3e0] ss:$16 sps:$4 sm:$0xff]   ;;  %v1714_v57 = vld [vmem:[#allocation8 + $0x3e8] ss:$16 sps:$4 sm:$0xff]  }
 0x173   :  { %1105 = vmatpush1.bf16.msra.mxu0 %v1633_v58  ;;  %1187 = vmatpush1.bf16.msra.mxu1 %v1636_v59  ;;  %v263_v58 = vmax.f32 %v255_v53, 0.0  ;;  %v1324_v59 = vpop.permute.xlu0 %1323 }
 0x174   :  { %1106 = vmatprep.subr.bf16.mxu0 %v1641_v60  ;;  %1188 = vmatprep.subr.bf16.mxu1 %v1644_v61  ;;  %1509 = vpush %v1324_v59  ;;  %v397_v60 = vld [vmem:[#allocation10] sm:$0xf]  ;;  %v1240_v61 = vsub.s32 4, %v2048_v4 }
 0x175   :  { %v267_v27 = vpack.c.bf16 %v263_v58, %v263_v58 }
 0x177   :  { %1107 = vmatpush1.bf16.msra.mxu0 %v1639_v62  ;;  %1189 = vmatpush1.bf16.msra.mxu1 %v1642_v63  ;;  %v1288_v62 = vsub.s32 5, %v2048_v4  ;;  %v1244_v63 = vsub.s32 6, %v2048_v4 }
 0x178   :  { %1108 = vmatprep.subr.bf16.mxu0 %v1647_v1  ;;  %1190 = vmatprep.subr.bf16.mxu1 %v1650_v2  ;;  %v1292_v1 = vsub.s32 7, %v2048_v4  ;;  %v402_v2 = vrot.slane %v397_v60, %v2056_v26 }
 0x17b   :  { %1109 = vmatpush1.bf16.msra.mxu0 %v1645_v3  ;;  %1191 = vmatpush1.bf16.msra.mxu1 %v1648_v5  ;;  %v1233_v3 = vrot.slane %v1227_v38, %v2056_v26  ;;  %v1281_v5 = vrot.slane %v1227_v38, %v2061_v28 }
 0x17c   :  { %1110 = vmatprep.subr.bf16.mxu0 %v1653_v6  ;;  %1192 = vmatprep.subr.bf16.mxu1 %v1656_v7  ;;  %v410_v6 = vrot.slane %v397_v60, %v2075_v43  ;;  %v406_v7 = vrot.slane %v397_v60, %v2061_v28 }
 0x17f   :  { %1111 = vmatpush1.bf16.msra.mxu0 %v1651_v8  ;;  %1193 = vmatpush1.bf16.msra.mxu1 %v1654_v9  ;;  %v1237_v8 = vrot.slane %v1227_v38, %v2075_v43  ;;  %v1285_v9 = vrot.slane %v1227_v38, %v2064_v29 }
 0x180   :  { %1112 = vmatprep.subr.bf16.mxu0 %v1659_v10  ;;  %1194 = vmatprep.subr.bf16.mxu1 %v1662_v11  ;;  %v414_v10 = vrot.slane %v397_v60, %v2064_v29 }
 0x183   :  { %1113 = vmatpush1.bf16.msra.mxu0 %v1657_v12  ;;  %1195 = vmatpush1.bf16.msra.mxu1 %v1660_v13  ;;  %v1241_v13 = vrot.slane %v1227_v38, %v1240_v61 }
 0x184   :  { %1114 = vmatprep.subr.bf16.mxu0 %v1665_v14  ;;  %1196 = vmatprep.subr.bf16.mxu1 %v1668_v15  ;;  %v1289_v14 = vrot.slane %v1227_v38, %v1288_v62  ;;  %v1245_v15 = vrot.slane %v1227_v38, %v1244_v63 }
 0x187   :  { %1115 = vmatpush1.bf16.msra.mxu0 %v1663_v16  ;;  %1197 = vmatpush1.bf16.msra.mxu1 %v1666_v17  ;;  %v1293_v16 = vrot.slane %v1227_v38, %v1292_v1 }
 0x188   :  { %1116 = vmatprep.subr.bf16.mxu0 %v1671_v18  ;;  %1198 = vmatprep.subr.bf16.mxu1 %v1674_v19  ;;  %v1253_v18 = vrot.slane %v1233_v3, %v2056_v26  ;;  %v1301_v19 = vrot.slane %v1281_v5, %v2061_v28 }
 0x18b   :  { %1117 = vmatpush1.bf16.msra.mxu0 %v1669_v20  ;;  %1199 = vmatpush1.bf16.msra.mxu1 %v1672_v21 }
 0x18c   :  { %1118 = vmatprep.subr.bf16.mxu0 %v1677_v22  ;;  %1200 = vmatprep.subr.bf16.mxu1 %v1680_v23 }
 0x18f   :  { %1119 = vmatpush1.bf16.msra.mxu0 %v1675_v24  ;;  %1201 = vmatpush1.bf16.msra.mxu1 %v1678_v25  ;;  %v1257_v24 = vrot.slane %v1237_v8, %v2056_v26  ;;  %v1305_v25 = vrot.slane %v1285_v9, %v2061_v28 }
 0x190   :  { %1120 = vmatprep.subr.bf16.mxu0 %v1683_v30  ;;  %1202 = vmatprep.subr.bf16.mxu1 %v1686_v31 }
 0x193   :  { %1121 = vmatpush1.bf16.msra.mxu0 %v1681_v32  ;;  %1203 = vmatpush1.bf16.msra.mxu1 %v1684_v33 }
 0x194   :  { %1122 = vmatprep.subr.bf16.mxu0 %v1689_v34  ;;  %1204 = vmatprep.subr.bf16.mxu1 %v1692_v35 }
 0x197   :  { %1123 = vmatpush1.bf16.msra.mxu0 %v1687_v36  ;;  %1205 = vmatpush1.bf16.msra.mxu1 %v1690_v37  ;;  %v1261_v36 = vrot.slane %v1241_v13, %v2056_v26  ;;  %v1309_v37 = vrot.slane %v1289_v14, %v2061_v28 }
 0x198   :  { %1124 = vmatprep.subr.bf16.mxu0 %v1695_v39  ;;  %1206 = vmatprep.subr.bf16.mxu1 %v1698_v40 }
 0x19b   :  { %1125 = vmatpush1.bf16.msra.mxu0 %v1693_v41  ;;  %1207 = vmatpush1.bf16.msra.mxu1 %v1696_v42  ;;  %v1265_v42 = vrot.slane %v1245_v15, %v2056_v26  ;;  %v1330_v26 = vand.u32 127, %v120_v0 }
 0x19c   :  { %1126 = vmatprep.subr.bf16.mxu0 %v1701_v44  ;;  %1208 = vmatprep.subr.bf16.mxu1 %v1704_v45 }
 0x19d   :  { %v1333_v58 = vsub.s32 %v1330_v26, %v2048_v4 }
 0x19f   :  { %1127 = vmatpush1.bf16.msra.mxu0 %v1699_v46  ;;  %1209 = vmatpush1.bf16.msra.mxu1 %v1702_v47  ;;  %v1313_v46 = vrot.slane %v1293_v16, %v2061_v28 }
 0x1a0   :  { %1128 = vmatprep.subr.bf16.mxu0 %v1707_v49  ;;  %1210 = vmatprep.subr.bf16.mxu1 %v1710_v50 }
 0x1a3   :  { %1129 = vmatpush1.bf16.msra.mxu0 %v1705_v51  ;;  %1211 = vmatpush1.bf16.msra.mxu1 %v1708_v52 }
 0x1a4   :  { %1130 = vmatprep.subr.bf16.mxu0 %v1713_v54  ;;  %1212 = vmatprep.subr.bf16.mxu1 %v1716_v55 }
 0x1a5   :  { %s1510_s12 = spop %1509 }
 0x1a6   :  { %v1326_v28 = vstv %s1510_s12 }
 0x1a7   :  { %1131 = vmatpush1.bf16.msra.mxu0 %v1711_v56  ;;  %1213 = vmatpush1.bf16.msra.mxu1 %v1714_v57  ;;  %v1276_v57 = vstv %s1508_s11 }
 0x1aa   :  { %1133 = vmatmul.mubr.bf16.vlgmr.msra.gmra.mrb[4].mxu0 %v267_v27  ;;  %1215 = vmatmul.mubr.bf16.vlgmr.msra.gmra.mrb[4].mxu1 %v267_v27 }
 0x27d   :  { %v1134_v11 = vpop.f32.mrb[4].mxu0  ;;  %v1216_v12 = vpop.f32.mrb[4].mxu1 }
 0x27e   :  { %v1495_v17 = vadd.f32 %v1134_v11, %v402_v2  ;;  %v1497_v20 = vadd.f32 %v1216_v12, %v410_v6  ;;  %v1136_v21 = vpop.f32.mrb[5].mxu0  ;;  %v1218_v22 = vpop.f32.mrb[5].mxu1 }
 0x27f   :  { %v1496_v23 = vadd.f32 %v1136_v21, %v406_v7  ;;  %v1498_v29 = vadd.f32 %v1218_v22, %v414_v10  ;;  %v1138_v30 = vpop.f32.mrb[6].mxu0  ;;  %v1220_v31 = vpop.f32.mrb[6].mxu1 }
 0x280   :  { %v1223_v32 = vmax.f32 %v1495_v17, 0.0  ;;  %v1139_v33 = vpop.f32.mrb[7].mxu0  ;;  %v1221_v34 = vpop.f32.mrb[7].mxu1  ;;  %v1225_v35 = vmax.f32 %v1497_v20, 0.0 }
 0x281   :  { %v1224_v39 = vmax.f32 %v1496_v23, 0.0  ;;  %v1226_v45 = vmax.f32 %v1498_v29, 0.0 }
 0x282   :  { %v1266_v40 = vmul.f32 %v1253_v18, %v1223_v32  ;;  %v1314_v41 = vmul.f32 %v1301_v19, %v1223_v32  ;;  %v1268_v47 = vmul.f32 %v1261_v36, %v1225_v35  ;;  %v1316_v48 = vmul.f32 %v1309_v37, %v1225_v35 }
 0x283   :  { %v1267_v43 = vmul.f32 %v1257_v24, %v1224_v39  ;;  %v1315_v44 = vmul.f32 %v1305_v25, %v1224_v39  ;;  %v1269_v51 = vmul.f32 %v1265_v42, %v1226_v45  ;;  %v1317_v52 = vmul.f32 %v1313_v46, %v1226_v45 }
 0x285   :  { %v1270_v49 = vadd.f32 %v1267_v43, %v1266_v40  ;;  %v1318_v50 = vadd.f32 %v1315_v44, %v1314_v41 }
 0x287   :  { %v1319_v53 = vadd.f32 %v1318_v50, %v1316_v48  ;;  %v1271_v54 = vadd.f32 %v1270_v49, %v1268_v47 }
 0x289   :  { %v1320_v55 = vadd.f32 %v1319_v53, %v1317_v52  ;;  %v1272_v56 = vadd.f32 %v1271_v54, %v1269_v51 }
 0x28b   :  { %1321 = vadd.xlane.f32.xlu1 %v1320_v55  ;;  %1273 = vadd.xlane.f32.xlu0 %v1272_v56 }
 0x318   :  { %v1322_v27 = vpop.xlane.xlu1 %1321  ;;  %v1274_v59 = vpop.xlane.xlu0 %1273 }
 0x319   :  { %v1327_v60 = vadd.f32 %v1326_v28, %v1322_v27  ;;  %v1277_v38 = vadd.f32 %v1276_v57, %v1274_v59 }
 0x31b   :  { %v1342_v61 = vrot.slane %v1327_v60, %v1333_v58  ;;  %v1334_v62 = vrot.slane %v1277_v38, %v1333_v58 }
 0x31d   :  { %1337 = vst.msk [vmem:[#allocation14] sm:$0x1] %vm1336_vm2, %v1334_v62  ;;  %1344 = vst.msk [vmem:[#allocation14 + $0x1] sm:$0x1] %vm1336_vm2, %v1342_v61 }
 0x31e   :  { %1882 = shalt.err (!%p1879_p4)
}
 0x31f   :  { %s1883_s27 = scalar_lea.hbm %s2121_s7, 32 }
 0x320   :  { %p1884_p5 = scmp.ne.s32.totalorder %s2121_s7, %s1883_s27  ;;  %p1887_p6 = scmp.lt.u32.totalorder %s1883_s27, %s2121_s7 }
 0x322   :  { %p1889_p7 = pnand %p1887_p6, %p1884_p5 }
 0x324   :  { %1892 = shalt.err (!%p1889_p7)
}
 0x325   :  { %1354 = dma.vmem_to_hbm [thread:$0]  %s1352_s0, 32, %s2121_s7, [#allocation4]  }
 0x326   :  { %1901 = dma.done.wait [#allocation4], 32  }
 0x327   :  { %1902 = vsyncadd [#allocation4], 4294967264 }
 0x328   :  { %1358 = vsyncpa [#allocation3], 1 }
 0x329   :  { %1359 = vsyncpa [#allocation6], 1 }
 0x32a   :  { %1360 = vsyncpa [#allocation9], 1 }
 0x32b   :  { %1361 = vsyncpa [#allocation12], 1 }
 0x32c   :  { %1362 = vsyncpa [#allocation4], 1 }

</bundles_post_ra>
